<compile_context>
chip_gen: v7x
topology: tpu7x:2x2x1
jax: 0.10.0
libtpu: 0.0.40
codegen_flags: <defaults>
</compile_context>

<pallas_src>
import jax
import jax.numpy as jnp
from jax.experimental import pallas as pl
from jax.experimental.pallas import tpu as pltpu


def _round_up(n, m):
    return ((n + m - 1) // m) * m


def _mlp_concat_decoder_kernel(x_ref, w1_ref, b1_ref, w2_ref, b2_ref, o_ref):
    # Layer 1 on the MXU: (tile, 2E) @ (2E, H) -> (tile, H), f32 accumulation.
    h = jnp.dot(x_ref[...], w1_ref[...], preferred_element_type=jnp.float32)
    h = jnp.maximum(h + b1_ref[...].astype(jnp.float32), 0.0)          # bias + ReLU in f32

    # Layer 2: contract H of w2 (1, H) against H of h (tile, H)  ->  (1, tile).
    # Batch lands on lanes, so the store below is a dense, unmasked lane-wide store.
    out_row = jax.lax.dot_general(
        w2_ref[...].astype(jnp.float32), h,
        dimension_numbers=(((1,), (1,)), ((), ())),
        preferred_element_type=jnp.float32,
    )
    out_row = out_row + b2_ref[0]                                       # scalar bias from SMEM
    o_ref[...] = out_row.astype(o_ref.dtype)


def mlp_concat_decoder(x, w1, b1, w2, b2, *, batch_tile=512, compute_dtype=None):
    """Forward pass of MlpConcatDecoder. x: [B, 2E] -> logits [B, 1]."""
    B, in_dim = x.shape
    H = w1.shape[1]
    out_dtype = x.dtype

    # Optional bf16 streaming of the bandwidth-dominant operands (v6e / v7x optimization).
    if compute_dtype is not None:
        x = x.astype(compute_dtype)
        w1 = w1.astype(compute_dtype)
        b1 = b1.astype(compute_dtype)

    b1 = b1.reshape(1, H)
    w2_row = w2.reshape(1, H).astype(jnp.float32)   # second layer weights as a lane row
    b2_s = b2.reshape(1).astype(jnp.float32)        # scalar bias -> SMEM

    # Tile choice: large tiles for throughput; single tile (rounded to 8 sublanes) for small B.
    if B > batch_tile:
        tile = batch_tile
        # Multi-tile lane-dense output blocks must be 128-lane aligned.
        assert tile % 128 == 0, "batch_tile must be a multiple of 128"
    else:
        tile = _round_up(B, 8)
    B_pad = _round_up(B, tile)
    if B_pad != B:
        x = jnp.pad(x, ((0, B_pad - B), (0, 0)))

    grid = (B_pad // tile,)
    out = pl.pallas_call(
        _mlp_concat_decoder_kernel,
        out_shape=jax.ShapeDtypeStruct((1, B_pad), out_dtype),   # lane-dense logits row
        grid=grid,
        in_specs=[
            pl.BlockSpec((tile, in_dim), lambda i: (i, 0)),      # x tile (streams over batch)
            pl.BlockSpec((in_dim, H), lambda i: (0, 0)),         # w1 (resident)
            pl.BlockSpec((1, H), lambda i: (0, 0)),              # b1 (resident)
            pl.BlockSpec((1, H), lambda i: (0, 0)),              # w2 row (resident)
            pl.BlockSpec(memory_space=pltpu.MemorySpace.SMEM),   # b2 scalar
        ],
        out_specs=pl.BlockSpec((1, tile), lambda i: (0, i)),
        compiler_params=pltpu.CompilerParams(
            dimension_semantics=("parallel",),                   # megacore-shard the batch axis
        ),
    )(x, w1, b1, w2_row, b2_s)

    return out.reshape(B_pad, 1)[:B]


def mlp_concat_decoder_predict(x, w1, b1, w2, b2, **kw):
    # torch.sigmoid(self.forward(x)) — sigmoid left in plain JAX (trivial epilogue).
    return jax.nn.sigmoid(mlp_concat_decoder(x, w1, b1, w2, b2, **kw))


def init_params(key, embedding_size, hidden_size, dtype=jnp.float32):
    """Deterministic init matching nn.Linear default (uniform +/- 1/sqrt(fan_in))."""
    in_dim = embedding_size * 2
    k1, k2, k3, k4 = jax.random.split(key, 4)
    bound1 = 1.0 / jnp.sqrt(in_dim)
    bound2 = 1.0 / jnp.sqrt(hidden_size)
    w1 = jax.random.uniform(k1, (in_dim, hidden_size), dtype, -bound1, bound1)
    b1 = jax.random.uniform(k2, (1, hidden_size), dtype, -bound1, bound1)
    w2 = jax.random.uniform(k3, (hidden_size, 1), dtype, -bound2, bound2)
    b2 = jax.random.uniform(k4, (1, 1), dtype, -bound2, bound2)
    return w1, b1, w2, b2


if __name__ == "__main__":
    embedding_size = 16   # -> input feature dim = 32 (concatenated pair embeddings)
    hidden_size = 32

    key = jax.random.PRNGKey(0)
    kx, kp = jax.random.split(key)
    w1, b1, w2, b2 = init_params(kp, embedding_size, hidden_size)

    def ref_fwd(xx, ww1, bb1):
        return jnp.maximum(xx @ ww1 + bb1, 0.0) @ w2 + b2

    # f32 path: single-tile, padded, and multi-tile (grid > 1) cases.
    for batch in (8, 100, 1024):
        x = jax.random.normal(jax.random.fold_in(kx, batch),
                              (batch, embedding_size * 2), jnp.float32)
        logits = mlp_concat_decoder(x, w1, b1, w2, b2)
        jax.block_until_ready(logits)
        ref = ref_fwd(x, w1, b1)
        assert logits.shape == (batch, 1)
        assert jnp.allclose(logits, ref, atol=1e-5, rtol=1e-5), (
            "f32 mismatch", batch, float(jnp.max(jnp.abs(logits - ref))))

    # bf16 input-streaming path (v6e / v7x HBM-bandwidth optimization).
    x = jax.random.normal(kx, (512, embedding_size * 2), jnp.float32)
    logits_bf16 = mlp_concat_decoder(x, w1, b1, w2, b2, compute_dtype=jnp.bfloat16)
    jax.block_until_ready(logits_bf16)
    xb = x.astype(jnp.bfloat16).astype(jnp.float32)
    w1b = w1.astype(jnp.bfloat16).astype(jnp.float32)
    b1b = b1.astype(jnp.bfloat16).astype(jnp.float32)
    ref_b = ref_fwd(xb, w1b, b1b)
    assert jnp.allclose(logits_bf16, ref_b, atol=1e-3, rtol=1e-3), (
        "bf16 mismatch", float(jnp.max(jnp.abs(logits_bf16 - ref_b))))

    probs = mlp_concat_decoder_predict(x, w1, b1, w2, b2)
    jax.block_until_ready(probs)
    assert probs.shape == (512, 1)

    print("KERNEL_OK")
</pallas_src>

<mosaic_0001>
module attributes {stable_mosaic.version = 11 : i64} {
  func.func @_mlp_concat_decoder_kernel(%arg0: i32, %arg1: memref<8x32xf32, #tpu.memory_space<vmem>>, %arg2: memref<32x32xf32, #tpu.memory_space<vmem>>, %arg3: memref<1x32xf32, #tpu.memory_space<vmem>>, %arg4: memref<1x32xf32, #tpu.memory_space<vmem>>, %arg5: memref<1xf32, #tpu.memory_space<smem>>, %arg6: memref<1x8xf32, #tpu.memory_space<vmem>>) attributes {dimension_semantics = [#tpu.dimension_semantics<parallel>], iteration_bounds = array<i64: 1>, scalar_prefetch = 0 : i64, scratch_operands = 0 : i64, tpu.core_type = #tpu.core_type<tc>, window_params = [{transform_indices = @transform_0, window_bounds = array<i64: 8, 32>}, {pipeline_mode = #tpu.pipeline_mode<synchronous>, transform_indices = @transform_1, window_bounds = array<i64: 32, 32>}, {pipeline_mode = #tpu.pipeline_mode<synchronous>, transform_indices = @transform_2, window_bounds = array<i64: 1, 32>}, {pipeline_mode = #tpu.pipeline_mode<synchronous>, transform_indices = @transform_3, window_bounds = array<i64: 1, 32>}, {transform_indices = @transform_4, window_bounds = array<i64: 1>}, {transform_indices = @transform_5, window_bounds = array<i64: 1, 8>}]} {
    %c0 = arith.constant 0 : index
    %c0_0 = arith.constant 0 : index
    %0 = vector.load %arg1[%c0, %c0_0] : memref<8x32xf32, #tpu.memory_space<vmem>>, vector<8x32xf32>
    %c0_1 = arith.constant 0 : index
    %c0_2 = arith.constant 0 : index
    %1 = vector.load %arg2[%c0_1, %c0_2] : memref<32x32xf32, #tpu.memory_space<vmem>>, vector<32x32xf32>
    %cst = arith.constant dense<0.000000e+00> : vector<8x32xf32>
    %2 = tpu.matmul %0, %1, %cst {dimension_numbers = #tpu.dot_dimension_numbers<[1], [0], [0], [1], [0, 0, 1, 1], [], []>} : vector<8x32xf32>, vector<32x32xf32>, vector<8x32xf32> -> vector<8x32xf32>
    %c0_3 = arith.constant 0 : index
    %c0_4 = arith.constant 0 : index
    %3 = vector.load %arg3[%c0_3, %c0_4] : memref<1x32xf32, #tpu.memory_space<vmem>>, vector<1x32xf32>
    %4 = vector.broadcast %3 : vector<1x32xf32> to vector<8x32xf32>
    %5 = arith.addf %2, %4 : vector<8x32xf32>
    %cst_5 = arith.constant 0.000000e+00 : f32
    %6 = vector.broadcast %cst_5 : f32 to vector<8x32xf32>
    %7 = arith.maximumf %5, %6 : vector<8x32xf32>
    %c0_6 = arith.constant 0 : index
    %c0_7 = arith.constant 0 : index
    %8 = vector.load %arg4[%c0_6, %c0_7] : memref<1x32xf32, #tpu.memory_space<vmem>>, vector<1x32xf32>
    %cst_8 = arith.constant dense<0.000000e+00> : vector<1x8xf32>
    %9 = tpu.matmul %8, %7, %cst_8 {dimension_numbers = #tpu.dot_dimension_numbers<[1], [1], [0], [0], [0, 0, 1, 0], [], []>} : vector<1x32xf32>, vector<8x32xf32>, vector<1x8xf32> -> vector<1x8xf32>
    %c0_9 = arith.constant 0 : index
    %10 = memref.load %arg5[%c0_9] : memref<1xf32, #tpu.memory_space<smem>>
    %11 = vector.broadcast %10 : f32 to vector<1x8xf32>
    %12 = arith.addf %9, %11 : vector<1x8xf32>
    %c0_10 = arith.constant 0 : index
    %c0_11 = arith.constant 0 : index
    %13 = vector.load %arg6[%c0_10, %c0_11] : memref<1x8xf32, #tpu.memory_space<vmem>>, vector<1x8xf32>
    tpu.vector_store %arg6[%c0_10, %c0_11], %12 {strides = array<i32>} : memref<1x8xf32, #tpu.memory_space<vmem>>, vector<1x8xf32>,
    return
  }
  func.func @transform_0(%arg0: i32) -> (i32, i32) {
    %c0_i32 = arith.constant 0 : i32
    %c0_i32_0 = arith.constant 0 : i32
    return %arg0, %c0_i32 : i32, i32
  }
  func.func @transform_1(%arg0: i32) -> (i32, i32) {
    %c0_i32 = arith.constant 0 : i32
    %c0_i32_0 = arith.constant 0 : i32
    %c0_i32_1 = arith.constant 0 : i32
    return %c0_i32, %c0_i32_0 : i32, i32
  }
  func.func @transform_2(%arg0: i32) -> (i32, i32) {
    %c0_i32 = arith.constant 0 : i32
    %c0_i32_0 = arith.constant 0 : i32
    %c0_i32_1 = arith.constant 0 : i32
    return %c0_i32, %c0_i32_0 : i32, i32
  }
  func.func @transform_3(%arg0: i32) -> (i32, i32) {
    %c0_i32 = arith.constant 0 : i32
    %c0_i32_0 = arith.constant 0 : i32
    %c0_i32_1 = arith.constant 0 : i32
    return %c0_i32, %c0_i32_0 : i32, i32
  }
  func.func @transform_4(%arg0: i32) -> i32 {
    %c0_i32 = arith.constant 0 : i32
    %c0_i32_0 = arith.constant 0 : i32
    return %c0_i32 : i32
  }
  func.func @transform_5(%arg0: i32) -> (i32, i32) {
    %c0_i32 = arith.constant 0 : i32
    %c0_i32_0 = arith.constant 0 : i32
    return %c0_i32, %arg0 : i32, i32
  }
}

</mosaic_0001>

<bundles_post_ra>
// kernel: tpu_custom_call.1
= control target key start
LH: loop header
LB: loop body
LE: loop exit
PB: predicated region body
PF: predicated region fallthrough
CT: control target
= control target key end

     0   :  { %11 = vsyncpa [#allocation4], 0  ;;  %s435_s0 = inlined_call_operand.hbm [shape: f32[8,32], index: 0, kind: input, shape index: {}]   ;;  %s436_s1 = inlined_call_operand.hbm [shape: f32[32,32], index: 1, kind: input, shape index: {}]   ;;  %s437_s2 = inlined_call_operand.vmem [shape: f32[1,32], index: 2, kind: input, shape index: {}]   ;;  %s438_s3 = inlined_call_operand.vmem [shape: f32[1,32], index: 3, kind: input, shape index: {}]   ;;  %s439_s4 = inlined_call_operand.<no memory space> [shape: f32[1], index: 4, kind: input, shape index: {}]   ;;  %s440_s5 = inlined_call_operand.hbm [shape: f32[1,8], index: 5, kind: output, shape index: {}]  }
   0x1   :  { %12 = vsyncpa [#allocation7], 0 }
   0x2   :  { %13 = vsyncpa [#allocation5], 0  ;;  %s345_s18 = smov [#allocation3]   ;;  %s346_s20 = smov [#allocation6]  }
   0x3   :  { %s20_s19 = sshll.u32 %s345_s18, 4  ;;  %s29_s21 = sshll.u32 %s346_s20, 4  ;;  %s21_s19 = int_to_ptr.vmem [resolvable:$true] %s20_s19  ;;  %s383_s21 = int_to_ptr.vmem [resolvable:$true] %s29_s21 }
   0x4   :  { %s273_s24 = scalar_lea.hbm %s435_s0, 128 }
   0x5   :  { %p274_p0 = scmp.ne.s32.totalorder %s435_s0, %s273_s24  ;;  %p277_p1 = scmp.lt.u32.totalorder %s273_s24, %s435_s0 }
   0x7   :  { %p279_p2 = pnand %p277_p1, %p274_p0 }
   0x9   :  { %282 = shalt.err (!%p279_p2)
}
   0xa   :  { %s283_s29 = scalar_lea.vmem %s21_s19, 128  ;;  %p288_p4 = scmp.lt.s32.totalorder %s21_s19, %s21_s19 }
   0xb   :  { %p284_p3 = scmp.ne.s32.totalorder %s21_s19, %s283_s29  ;;  %p289_p5 = scmp.lt.s32.totalorder %s283_s29, %s283_s29 }
   0xd   :  { %p290_p6 = por %p289_p5, %p288_p4 }
   0xf   :  { %p291_p7 = pnand %p290_p6, %p284_p3 }
  0x11   :  { %294 = shalt.err (!%p291_p7)
}
  0x12   :  { %23 = dma.hbm_to_vmem [thread:$0]  %s435_s0, 128, %s21_s19, [#allocation4]  }
  0x13   :  { %s295_s9 = scalar_lea.hbm %s436_s1, 512 }
  0x14   :  { %p296_p8 = scmp.ne.s32.totalorder %s436_s1, %s295_s9  ;;  %p299_p9 = scmp.lt.u32.totalorder %s295_s9, %s436_s1 }
  0x16   :  { %p301_p10 = pnand %p299_p9, %p296_p8 }
  0x18   :  { %304 = shalt.err (!%p301_p10)
}
  0x19   :  { %s305_s14 = scalar_lea.vmem %s383_s21, 512  ;;  %p310_p12 = scmp.lt.s32.totalorder %s383_s21, %s383_s21 }
  0x1a   :  { %p306_p11 = scmp.ne.s32.totalorder %s383_s21, %s305_s14  ;;  %p311_p13 = scmp.lt.s32.totalorder %s305_s14, %s305_s14 }
  0x1c   :  { %p312_p0 = por %p311_p13, %p310_p12 }
  0x1e   :  { %p313_p1 = pnand %p312_p0, %p306_p11 }
  0x20   :  { %316 = shalt.err (!%p313_p1)
}
  0x21   :  { %s347_s0 = smov 128   ;;  %s348_s15 = smov 8  }
  0x22   :  { %35 = dma.hbm_to_vmem [thread:$0]  %s436_s1, 512, %s383_s21, [#allocation7], %s347_s0, %s347_s0, %s348_s15  }
  0x23   :  { %339 = dma.done.wait [#allocation4], 128  }
  0x24   :  { %340 = vsyncadd [#allocation4], 4294967168 }
  0x25   :  { %341 = dma.done.wait [#allocation7], 512  }
  0x26   :  { %342 = vsyncadd [#allocation7], 4294966784  ;;  %v349_v0 = vmov 0.0|0.0   ;;  %vm350_vm0 = vmmov 0   ;;  %v351_v1 = vmov 0.0   ;;  %v49_v2 = vld [vmem:[#allocation6] sm:$0xff]  ;;  %v137_v15 = vstv %s439_s4 }
  0x27   :  { %259 = vmatprep.subr.bf16.mxu0 %v349_v0  ;;  %251 = vmatprep.mubr.msk.f32.mxu0 %vm350_vm0, %v351_v1  ;;  %v50_v3 = vld [vmem:[#allocation6 + $0x8] sm:$0xff]  ;;  %v51_v4 = vld [vmem:[#allocation6 + $0x10] sm:$0xff]  ;;  %v52_v6 = vld [vmem:[#allocation6 + $0x18] sm:$0xff]  ;;  %vm60_vm1 = vcmask 261120   ;;  %s352_s23 = smov [#allocation8]   ;;  %vm214_vm2 = vcmask 57344  }
  0x28   :  { %254 = vmatprep.subr.mxu1 %v351_v1  ;;  %256 = vmatprep.mubr.msk.f32.mxu1 %vm350_vm0, %v351_v1  ;;  %v260_v5 = vpack.c.bf16 %v50_v3, %v49_v2  ;;  %v263_v7 = vpack.c.bf16 %v52_v6, %v51_v4  ;;  %v48_v8 = vld [vmem:[#allocation3] sm:$0xff]  ;;  %s222_s24 = sshll.u32 %s352_s23, 4  ;;  %s223_s24 = int_to_ptr.vmem [resolvable:$true] %s222_s24 }
  0x29   :  { %v232_v9 = vld [vmem:[%s437_s2] ss:$0 sm:$0xff]  ;;  %s317_s2 = scalar_lea.vmem %s223_s24, 16  ;;  %s321_s25 = scalar_lea.vmem %s223_s24, 32 }
  0x2a   :  { %261 = vmatpush3.bf16.msra.mxu0 %v260_v5  ;;  %v135_v14 = vld [vmem:[%s438_s3] sm:$0x1]  ;;  %p318_p2 = scmp.ne.s32.totalorder %s223_s24, %s317_s2  ;;  %p322_p3 = scmp.lt.s32.totalorder %s223_s24, %s223_s24 }
  0x2b   :  { %262 = vmatprep.subr.bf16.mxu0 %v349_v0  ;;  %p323_p4 = scmp.lt.s32.totalorder %s321_s25, %s317_s2 }
  0x2d   :  { %p324_p5 = por %p323_p4, %p322_p3 }
  0x2e   :  { %264 = vmatpush3.bf16.msra.mxu0 %v263_v7 }
  0x2f   :  { %p325_p6 = pnand %p324_p5, %p318_p2 }
  0x31   :  { %252 = vmatmul.mubr.msk.f32.vlgmr.msra.gmra.mrb[0].mxu0 %vm60_vm1, %v48_v8 }
 0x104   :  { %v130_v10 = vpop.f32.mrb[0].mxu0 }
 0x105   :  { %v131_v11 = vadd.f32 %v232_v9, %v130_v10  ;;  %v253_v12 = vpop.f32.mrb[1].mxu0 }
 0x107   :  { %v134_v13 = vmax.f32 %v131_v11, 0.0 }
 0x109   :  { %255 = vmatpush3.xpose.msk.msra.mxu1 %vm60_vm1, %v134_v13 }
 0x10c   :  { %257 = vmatmul.mubr.msk.f32.vlgmr.msra.gmra.mrb[0].mxu1 %vm60_vm1, %v135_v14 }
 0x1df   :  { %v210_v16 = vpop.f32.mrb[0].mxu1 }
 0x1e0   :  { %v211_v17 = vadd.f32 %v210_v16, %v137_v15  ;;  %v258_v18 = vpop.f32.mrb[1].mxu1 }
 0x1e2   :  { %215 = vst.msk [vmem:[#allocation8] sm:$0x1] %vm214_vm2, %v211_v17 }
 0x1e3   :  { %328 = shalt.err (!%p325_p6)
}
 0x1e4   :  { %s329_s4 = scalar_lea.hbm %s440_s5, 16 }
 0x1e5   :  { %p330_p7 = scmp.ne.s32.totalorder %s440_s5, %s329_s4  ;;  %p333_p8 = scmp.lt.u32.totalorder %s329_s4, %s440_s5 }
 0x1e7   :  { %p335_p9 = pnand %p333_p8, %p330_p7 }
 0x1e9   :  { %338 = shalt.err (!%p335_p9)
}
 0x1ea   :  { %225 = dma.vmem_to_hbm [thread:$0]  %s223_s24, 16, %s440_s5, [#allocation5]  }
 0x1eb   :  { %343 = dma.done.wait [#allocation5], 16  }
 0x1ec   :  { %344 = vsyncadd [#allocation5], 4294967280 }
 0x1ed   :  { %229 = vsyncpa [#allocation4], 1 }
 0x1ee   :  { %230 = vsyncpa [#allocation7], 1 }
 0x1ef   :  { %231 = vsyncpa [#allocation5], 1 }

</bundles_post_ra>
